<compile_context>
chip_gen: v7x
topology: tpu7x:2x2x1
jax: 0.10.0
libtpu: 0.0.40
codegen_flags: <defaults>
</compile_context>

<pallas_src>
import functools
import math

import jax
import jax.numpy as jnp
from jax.experimental import pallas as pl
from jax.experimental.pallas import tpu as pltpu

_MIB = 1024 * 1024


def _round_up(v, m):
    return (v + m - 1) // m * m


def _gen_defaults():
    """Generation-aware knobs: token-tile roofline target, multi-core hint,
    VMEM cap for the compiler, and the tile-selection VMEM budget."""
    kind = ""
    try:
        kind = jax.devices()[0].device_kind.lower()
    except Exception:
        pass

    vmem_phys = None
    try:
        vmem_phys = int(pltpu.get_tpu_info().vmem_capacity_bytes)
    except Exception:
        vmem_phys = None

    if "v7" in kind:
        tm_target, multi_core, phys = 384, True, 64 * _MIB
    elif "v6" in kind or "trillium" in kind:
        tm_target, multi_core, phys = 768, False, 128 * _MIB
    elif "v5e" in kind or "v5 lite" in kind or "v5lite" in kind:
        tm_target, multi_core, phys = 256, False, 128 * _MIB
    elif "v5" in kind or "v4" in kind:
        tm_target, multi_core, phys = 256, True, 128 * _MIB
    else:  # unknown generation: be conservative about VMEM
        tm_target, multi_core, phys = 256, False, 64 * _MIB

    if vmem_phys is None:
        vmem_phys = phys

    # Never claim all of physical VMEM (compiler internal scratch needs room):
    # ~56 MiB on v7x's 64 MiB parts, capped at 100 MiB on the 128 MiB parts.
    vmem_cap = int(min(vmem_phys - 8 * _MIB, 100 * _MIB))
    vmem_budget = int(vmem_cap * 0.85)  # headroom for f32 gate/up/h temporaries
    return tm_target, multi_core, vmem_cap, vmem_budget


def _select_tiles(T, H, I, itemsize, tm_target, vmem_budget):
    """Pick (TM, TI, Hp) that fit the per-generation VMEM budget."""
    Hp = _round_up(H, 128)
    sub = 8 if itemsize >= 4 else 16  # sublane packing for sub-32-bit dtypes

    if T >= 128:
        # MXU-friendly token tile, capped at the compute/BW crossover target.
        TM = min(_round_up(T, 128), _round_up(tm_target, 128))
    else:
        TM = _round_up(T, sub)

    # Keep TI large (don't collapse to 128 for awkward I); Ip is padded up to
    # a multiple of TI later (zero-padded intermediate rows contribute zero).
    TI = min(512, _round_up(I, 128))

    def est(tm, ti):
        # 2x double-buffered blocks (x, fused gate|up, down, out)
        dbl = 2 * (tm * Hp + Hp * 2 * ti + ti * Hp + tm * Hp) * itemsize
        acc = tm * Hp * 4                 # f32 accumulator scratch
        temps = 4 * tm * 2 * ti * 4       # f32 gu/gate/up/h temporaries
        return dbl + acc + temps

    while est(TM, TI) > vmem_budget and TI > 128:
        TI -= 128
    while est(TM, TI) > vmem_budget and TM > 128:
        TM -= 128
    while est(TM, TI) > vmem_budget and TM > sub:
        TM = _round_up(max(sub, TM // 2), sub)
    return TM, TI, Hp


def _mlp_kernel(x_ref, wgu_ref, wd_ref, o_ref, acc_ref, *, ti, h_dtype):
    """One (core-split, token-tile, intermediate-tile) step of the fused MLP.

    x_ref   : (TM, Hp)      activations
    wgu_ref : (Hp, 2*TI)    fused [gate_k | up_k] weights, K-major
    wd_ref  : (TI, Hp)      down-projection weights, K-major
    o_ref   : (TM, Hp)      (partial) output tile, resident across k
    acc_ref : (TM, Hp) f32  VMEM accumulator
    """
    k = pl.program_id(2)

    @pl.when(k == 0)
    def _():
        acc_ref[...] = jnp.zeros_like(acc_ref)

    x = x_ref[...]  # native dtype -> MXU-friendly operands

    # Single fused matmul for gate and up: (TM, Hp) @ (Hp, 2*TI) -> (TM, 2*TI)
    gu = jnp.dot(x, wgu_ref[...], preferred_element_type=jnp.float32)
    gate = gu[:, :ti]
    up = gu[:, ti:]

    # Numerically stable SiLU in f32: exp(-|g|) never overflows, and the
    # EUP approximate reciprocal (free slot) never sees inf.
    z = jnp.exp(-jnp.abs(gate))
    inv = pl.reciprocal(1.0 + z, approx=True)
    sig = jnp.where(gate >= 0, inv, z * inv)
    h = (gate * sig * up).astype(h_dtype)

    # Down projection: contract the intermediate axis, accumulate in f32.
    acc_ref[...] += jnp.dot(h, wd_ref[...], preferred_element_type=jnp.float32)

    @pl.when(k == pl.num_programs(2) - 1)
    def _():
        o_ref[...] = acc_ref[...].astype(o_ref.dtype)


def mlp_forward(x, w_gate, w_up, w_down, *, down_input_dtype=None):
    """SwiGLU MLP forward: down(silu(gate(x)) * up(x)).

    x       : (..., hidden)
    w_gate  : (intermediate, hidden)   PyTorch nn.Linear (out, in) layout
    w_up    : (intermediate, hidden)
    w_down  : (hidden, intermediate)
    down_input_dtype : optional dtype for the down-matmul LHS (e.g. bfloat16
        for ~2x MXU throughput when feeding f32 activations); defaults to
        x.dtype.  Accumulation is always f32.
    """
    lead = x.shape[:-1]
    H = x.shape[-1]
    I = w_gate.shape[0]
    T = int(math.prod(lead)) if lead else 1
    dt = x.dtype
    itemsize = jnp.dtype(dt).itemsize
    h_dtype = jnp.dtype(down_input_dtype) if down_input_dtype is not None else dt

    tm_target, multi_core, vmem_cap, vmem_budget = _gen_defaults()
    TM, TI, Hp = _select_tiles(T, H, I, itemsize, tm_target, vmem_budget)

    Tp = _round_up(T, TM)
    Ip = _round_up(I, TI)
    n_tok = Tp // TM
    nK = Ip // TI

    # Decode-shaped inputs (a single token tile) can't shard the parallel
    # token axis across two TensorCores; split the reduction axis instead and
    # sum the two partial outputs in the wrapper.
    core_split = 2 if (multi_core and n_tok == 1 and nK >= 2 and nK % 2 == 0) else 1
    k_per_core = nK // core_split

    # ---- One-time wrapper-side layout work (K-major weights, fused gate|up).
    x2d = x.reshape(T, H)
    if (Tp, Hp) != (T, H):
        x2d = jnp.pad(x2d, ((0, Tp - T), (0, Hp - H)))

    wg_t = jnp.pad(w_gate.T, ((0, Hp - H), (0, Ip - I)))   # (Hp, Ip) K-major
    wu_t = jnp.pad(w_up.T, ((0, Hp - H), (0, Ip - I)))     # (Hp, Ip) K-major
    wd_t = jnp.pad(w_down.T, ((0, Ip - I), (0, Hp - H)))   # (Ip, Hp) K-major

    # Per-TI-tile interleave so each grid step reads one contiguous
    # (Hp, 2*TI) block laid out as [gate_k | up_k].
    wgu = jnp.stack(
        [wg_t.reshape(Hp, nK, TI), wu_t.reshape(Hp, nK, TI)], axis=2
    ).reshape(Hp, nK * 2 * TI)

    grid = (core_split, n_tok, k_per_core)

    w_bytes = (wgu.size + wd_t.size) * itemsize
    x_bytes = x2d.size * itemsize
    out_bytes = core_split * Tp * Hp * itemsize
    cost = pl.CostEstimate(
        flops=6 * Tp * Hp * Ip,               # three matmuls, 2*T*H*I each
        transcendentals=2 * Tp * Ip,          # exp + reciprocal per gate elem
        bytes_accessed=int(x_bytes * core_split + w_bytes * n_tok + out_bytes),
    )

    kernel = functools.partial(_mlp_kernel, ti=TI, h_dtype=h_dtype)

    partials = pl.pallas_call(
        kernel,
        out_shape=jax.ShapeDtypeStruct((core_split, Tp, Hp), dt),
        grid_spec=pltpu.PrefetchScalarGridSpec(
            num_scalar_prefetch=0,
            grid=grid,
            in_specs=[
                pl.BlockSpec((TM, Hp), lambda c, i, k: (i, 0)),                 # x
                pl.BlockSpec((Hp, 2 * TI),
                             lambda c, i, k: (0, c * k_per_core + k)),          # [gate|up]
                pl.BlockSpec((TI, Hp),
                             lambda c, i, k: (c * k_per_core + k, 0)),          # down
            ],
            out_specs=pl.BlockSpec((None, TM, Hp), lambda c, i, k: (c, i, 0)),
            scratch_shapes=[pltpu.VMEM((TM, Hp), jnp.float32)],
        ),
        compiler_params=pltpu.CompilerParams(
            dimension_semantics=("parallel", "parallel", "arbitrary"),
            vmem_limit_bytes=int(vmem_cap),
        ),
        cost_estimate=cost,
    )(x2d, wgu, wd_t)

    out2d = partials[0] if core_split == 1 else jnp.sum(partials, axis=0)
    return out2d[:T, :H].reshape(*lead, H)


def _reference(x, w_gate, w_up, w_down):
    g = x @ w_gate.T
    g = g * jax.nn.sigmoid(g)
    u = x @ w_up.T
    return (g * u) @ w_down.T


if __name__ == "__main__":
    # Small shapes consistent with the module: hidden_size=32 -> intermediate=85.
    B, S, H = 2, 8, 32
    I = int(H * 2.68)  # 85, matches int(hidden_size * 2.68)

    key = jax.random.PRNGKey(0)
    kx, kg, ku, kd = jax.random.split(key, 4)

    x = jax.random.normal(kx, (B, S, H), dtype=jnp.float32)

    # Deterministic init mimicking nn.Linear default: U(-1/sqrt(fan_in), 1/sqrt(fan_in))
    bound_h = 1.0 / (H ** 0.5)
    bound_i = 1.0 / (I ** 0.5)
    w_gate = jax.random.uniform(kg, (I, H), jnp.float32, -bound_h, bound_h)
    w_up = jax.random.uniform(ku, (I, H), jnp.float32, -bound_h, bound_h)
    w_down = jax.random.uniform(kd, (H, I), jnp.float32, -bound_i, bound_i)

    out = mlp_forward(x, w_gate, w_up, w_down)
    jax.block_until_ready(out)

    ref = _reference(x, w_gate, w_up, w_down)
    assert out.shape == (B, S, H)
    # Tolerance covers the EUP approximate reciprocal in SiLU and the MXU's
    # multi-pass bf16 handling of f32 matmul operands.
    assert jnp.allclose(out, ref, atol=2e-2, rtol=2e-2), "mismatch vs reference"

    print("KERNEL_OK")
</pallas_src>

<mosaic_0001>
module attributes {stable_mosaic.version = 11 : i64} {
  func.func @_mlp_kernel(%arg0: i32, %arg1: i32, %arg2: i32, %arg3: memref<16x128xf32, #tpu.memory_space<vmem>>, %arg4: memref<128x256xf32, #tpu.memory_space<vmem>>, %arg5: memref<128x128xf32, #tpu.memory_space<vmem>>, %arg6: memref<1x16x128xf32, #tpu.memory_space<vmem>>, %arg7: memref<16x128xf32, #tpu.memory_space<vmem>>) attributes {dimension_semantics = [#tpu.dimension_semantics<parallel>, #tpu.dimension_semantics<parallel>, #tpu.dimension_semantics<arbitrary>], iteration_bounds = array<i64: 1, 1, 1>, scalar_prefetch = 0 : i64, scratch_operands = 1 : i64, tpu.core_type = #tpu.core_type<tc>, window_params = [{transform_indices = @transform_0, window_bounds = array<i64: 16, 128>}, {transform_indices = @transform_1, window_bounds = array<i64: 128, 256>}, {transform_indices = @transform_2, window_bounds = array<i64: 128, 128>}, {transform_indices = @transform_3, window_bounds = array<i64: 1, 16, 128>}]} {
    %c0_i32 = arith.constant 0 : i32
    %0 = arith.cmpi eq, %arg2, %c0_i32 : i32
    %1 = arith.extui %0 : i1 to i32
    %c0_i32_0 = arith.constant 0 : i32
    %2 = arith.cmpi ne, %1, %c0_i32_0 : i32
    scf.if %2 {
      %cst_16 = arith.constant 0.000000e+00 : f32
      %29 = vector.broadcast %cst_16 : f32 to vector<16x128xf32>
      %c0_17 = arith.constant 0 : index
      %c0_18 = arith.constant 0 : index
      %30 = vector.load %arg7[%c0_17, %c0_18] : memref<16x128xf32, #tpu.memory_space<vmem>>, vector<16x128xf32>
      tpu.vector_store %arg7[%c0_17, %c0_18], %29 {strides = array<i32>} : memref<16x128xf32, #tpu.memory_space<vmem>>, vector<16x128xf32>,
    } else {
    }
    %c0 = arith.constant 0 : index
    %c0_1 = arith.constant 0 : index
    %3 = vector.load %arg3[%c0, %c0_1] : memref<16x128xf32, #tpu.memory_space<vmem>>, vector<16x128xf32>
    %c0_2 = arith.constant 0 : index
    %c0_3 = arith.constant 0 : index
    %4 = vector.load %arg4[%c0_2, %c0_3] : memref<128x256xf32, #tpu.memory_space<vmem>>, vector<128x256xf32>
    %cst = arith.constant dense<0.000000e+00> : vector<16x256xf32>
    %5 = tpu.matmul %3, %4, %cst {dimension_numbers = #tpu.dot_dimension_numbers<[1], [0], [0], [1], [0, 0, 1, 1], [], []>} : vector<16x128xf32>, vector<128x256xf32>, vector<16x256xf32> -> vector<16x256xf32>
    %6 = vector.extract_strided_slice %5 {offsets = [0, 0], sizes = [16, 128], strides = [1, 1]} : vector<16x256xf32> to vector<16x128xf32>
    %7 = vector.extract_strided_slice %5 {offsets = [0, 128], sizes = [16, 128], strides = [1, 1]} : vector<16x256xf32> to vector<16x128xf32>
    %8 = math.absf %6 : vector<16x128xf32>
    %cst_4 = arith.constant 0.000000e+00 : f32
    %9 = vector.broadcast %cst_4 : f32 to vector<16x128xf32>
    %10 = arith.subf %9, %8 : vector<16x128xf32>
    %11 = math.exp %10 : vector<16x128xf32>
    %cst_5 = arith.constant 1.000000e+00 : f32
    %12 = vector.broadcast %cst_5 : f32 to vector<16x128xf32>
    %13 = arith.addf %12, %11 : vector<16x128xf32>
    %14 = tpu.reciprocal %13 {approx = true} : vector<16x128xf32> -> vector<16x128xf32>
    %cst_6 = arith.constant 0.000000e+00 : f32
    %15 = vector.broadcast %cst_6 : f32 to vector<16x128xf32>
    %16 = arith.cmpf oge, %6, %15 : vector<16x128xf32>
    %17 = arith.mulf %11, %14 : vector<16x128xf32>
    %18 = arith.select %16, %14, %17 : vector<16x128xi1>, vector<16x128xf32>
    %19 = arith.mulf %6, %18 : vector<16x128xf32>
    %20 = arith.mulf %19, %7 : vector<16x128xf32>
    %c0_7 = arith.constant 0 : index
    %c0_8 = arith.constant 0 : index
    %21 = vector.load %arg7[%c0_7, %c0_8] : memref<16x128xf32, #tpu.memory_space<vmem>>, vector<16x128xf32>
    %c0_9 = arith.constant 0 : index
    %c0_10 = arith.constant 0 : index
    %22 = vector.load %arg5[%c0_9, %c0_10] : memref<128x128xf32, #tpu.memory_space<vmem>>, vector<128x128xf32>
    %cst_11 = arith.constant dense<0.000000e+00> : vector<16x128xf32>
    %23 = tpu.matmul %20, %22, %cst_11 {dimension_numbers = #tpu.dot_dimension_numbers<[1], [0], [0], [1], [0, 0, 1, 1], [], []>} : vector<16x128xf32>, vector<128x128xf32>, vector<16x128xf32> -> vector<16x128xf32>
    %24 = arith.addf %21, %23 : vector<16x128xf32>
    %c0_12 = arith.constant 0 : index
    %c0_13 = arith.constant 0 : index
    %25 = vector.load %arg7[%c0_12, %c0_13] : memref<16x128xf32, #tpu.memory_space<vmem>>, vector<16x128xf32>
    tpu.vector_store %arg7[%c0_12, %c0_13], %24 {strides = array<i32>} : memref<16x128xf32, #tpu.memory_space<vmem>>, vector<16x128xf32>,
    %c0_i32_14 = arith.constant 0 : i32
    %26 = arith.cmpi eq, %arg2, %c0_i32_14 : i32
    %27 = arith.extui %26 : i1 to i32
    %c0_i32_15 = arith.constant 0 : i32
    %28 = arith.cmpi ne, %27, %c0_i32_15 : i32
    scf.if %28 {
      %c0_16 = arith.constant 0 : index
      %c0_17 = arith.constant 0 : index
      %29 = vector.load %arg7[%c0_16, %c0_17] : memref<16x128xf32, #tpu.memory_space<vmem>>, vector<16x128xf32>
      %c0_18 = arith.constant 0 : index
      %c0_19 = arith.constant 0 : index
      %c0_20 = arith.constant 0 : index
      %30 = vector.load %arg6[%c0_18, %c0_19, %c0_20] : memref<1x16x128xf32, #tpu.memory_space<vmem>>, vector<1x16x128xf32>
      %31 = vector.shape_cast %30 : vector<1x16x128xf32> to vector<16x128xf32>
      %32 = vector.shape_cast %29 : vector<16x128xf32> to vector<1x16x128xf32>
      tpu.vector_store %arg6[%c0_18, %c0_19, %c0_20], %32 {strides = array<i32>} : memref<1x16x128xf32, #tpu.memory_space<vmem>>, vector<1x16x128xf32>,
    } else {
    }
    return
  }
  func.func @transform_0(%arg0: i32, %arg1: i32, %arg2: i32) -> (i32, i32) {
    %c0_i32 = arith.constant 0 : i32
    %c0_i32_0 = arith.constant 0 : i32
    return %arg1, %c0_i32 : i32, i32
  }
  func.func @transform_1(%arg0: i32, %arg1: i32, %arg2: i32) -> (i32, i32) {
    %c1_i32 = arith.constant 1 : i32
    %0 = arith.muli %arg0, %c1_i32 : i32
    %1 = arith.addi %0, %arg2 : i32
    %c0_i32 = arith.constant 0 : i32
    %c0_i32_0 = arith.constant 0 : i32
    return %c0_i32, %1 : i32, i32
  }
  func.func @transform_2(%arg0: i32, %arg1: i32, %arg2: i32) -> (i32, i32) {
    %c1_i32 = arith.constant 1 : i32
    %0 = arith.muli %arg0, %c1_i32 : i32
    %1 = arith.addi %0, %arg2 : i32
    %c0_i32 = arith.constant 0 : i32
    %c0_i32_0 = arith.constant 0 : i32
    return %1, %c0_i32 : i32, i32
  }
  func.func @transform_3(%arg0: i32, %arg1: i32, %arg2: i32) -> (i32, i32, i32) {
    %c0_i32 = arith.constant 0 : i32
    %c0_i32_0 = arith.constant 0 : i32
    return %arg0, %arg1, %c0_i32 : i32, i32, i32
  }
}

</mosaic_0001>

<bundles_post_ra>
// kernel: tpu_custom_call.1
= control target key start
LH: loop header
LB: loop body
LE: loop exit
PB: predicated region body
PF: predicated region fallthrough
CT: control target
= control target key end

     0   :  { %8 = vsyncpa [#allocation4], 0  ;;  %s645_s0 = inlined_call_operand.hbm [shape: f32[16,128], index: 0, kind: input, shape index: {}]   ;;  %s646_s1 = inlined_call_operand.hbm [shape: f32[128,256], index: 1, kind: input, shape index: {}]   ;;  %s647_s2 = inlined_call_operand.hbm [shape: f32[128,128], index: 2, kind: input, shape index: {}]   ;;  %s648_s3 = inlined_call_operand.hbm [shape: f32[1,16,128], index: 3, kind: output, shape index: {}]  }
   0x1   :  { %9 = vsyncpa [#allocation7], 0 }
   0x2   :  { %10 = vsyncpa [#allocation5], 0  ;;  %s557_s12 = smov [#allocation6]   ;;  %s463_s16 = scalar_lea.hbm %s646_s1, 4096 }
   0x3   :  { %s32_s13 = sshll.u32 %s557_s12, 4  ;;  %p464_p0 = scmp.ne.s32.totalorder %s646_s1, %s463_s16  ;;  %s33_s13 = int_to_ptr.vmem [resolvable:$true] %s32_s13 }
   0x4   :  { %p467_p1 = scmp.lt.u32.totalorder %s463_s16, %s646_s1 }
   0x6   :  { %p469_p2 = pnand %p467_p1, %p464_p0 }
   0x8   :  { %472 = shalt.err (!%p469_p2)
}
   0x9   :  { %s473_s21 = scalar_lea.vmem %s33_s13, 4096  ;;  %p478_p4 = scmp.lt.s32.totalorder %s33_s13, %s33_s13 }
   0xa   :  { %p474_p3 = scmp.ne.s32.totalorder %s33_s13, %s473_s21  ;;  %p479_p5 = scmp.lt.s32.totalorder %s473_s21, %s473_s21 }
   0xc   :  { %p480_p6 = por %p479_p5, %p478_p4 }
   0xe   :  { %p481_p7 = pnand %p480_p6, %p474_p3 }
  0x10   :  { %484 = shalt.err (!%p481_p7)
}
  0x11   :  { %s558_s22 = smov 256   ;;  %s559_s23 = smov 16  }
  0x12   :  { %38 = dma.hbm_to_vmem [thread:$0]  %s646_s1, 4096, %s33_s13, [#allocation7], %s558_s22, %s558_s22, %s559_s23  }
  0x13   :  { %s560_s26 = smov [#allocation3]   ;;  %s485_s30 = scalar_lea.hbm %s645_s0, 256 }
  0x14   :  { %s16_s27 = sshll.u32 %s560_s26, 4  ;;  %p486_p8 = scmp.ne.s32.totalorder %s645_s0, %s485_s30  ;;  %s17_s27 = int_to_ptr.vmem [resolvable:$true] %s16_s27 }
  0x15   :  { %p489_p9 = scmp.lt.u32.totalorder %s485_s30, %s645_s0 }
  0x17   :  { %p491_p10 = pnand %p489_p9, %p486_p8 }
  0x19   :  { %494 = shalt.err (!%p491_p10)
}
  0x1a   :  { %s495_s8 = scalar_lea.vmem %s17_s27, 256  ;;  %p500_p12 = scmp.lt.s32.totalorder %s17_s27, %s17_s27 }
  0x1b   :  { %p496_p11 = scmp.ne.s32.totalorder %s17_s27, %s495_s8  ;;  %p501_p13 = scmp.lt.s32.totalorder %s495_s8, %s495_s8 }
  0x1d   :  { %p502_p0 = por %p501_p13, %p500_p12 }
  0x1f   :  { %p503_p1 = pnand %p502_p0, %p496_p11 }
  0x21   :  { %506 = shalt.err (!%p503_p1)
}
  0x22   :  { %s561_s1 = smov 128   ;;  %s562_s9 = smov 8  }
  0x23   :  { %22 = dma.hbm_to_vmem [thread:$0]  %s645_s0, 256, %s17_s27, [#allocation4], %s561_s1, %s561_s1, %s562_s9  }
  0x24   :  { %s563_s12 = smov [#allocation8]   ;;  %s507_s16 = scalar_lea.hbm %s647_s2, 2048 }
  0x25   :  { %s48_s13 = sshll.u32 %s563_s12, 4  ;;  %p508_p2 = scmp.ne.s32.totalorder %s647_s2, %s507_s16  ;;  %s49_s13 = int_to_ptr.vmem [resolvable:$true] %s48_s13 }
  0x26   :  { %p511_p3 = scmp.lt.u32.totalorder %s507_s16, %s647_s2 }
  0x28   :  { %p513_p4 = pnand %p511_p3, %p508_p2 }
  0x2a   :  { %516 = shalt.err (!%p513_p4)
}
  0x2b   :  { %s517_s21 = scalar_lea.vmem %s49_s13, 2048  ;;  %p522_p6 = scmp.lt.s32.totalorder %s49_s13, %s49_s13 }
  0x2c   :  { %p518_p5 = scmp.ne.s32.totalorder %s49_s13, %s517_s21  ;;  %p523_p7 = scmp.lt.s32.totalorder %s517_s21, %s517_s21 }
  0x2e   :  { %p524_p8 = por %p523_p7, %p522_p6 }
  0x30   :  { %p525_p9 = pnand %p524_p8, %p518_p5 }
  0x32   :  { %528 = shalt.err (!%p525_p9)
}
  0x33   :  { %54 = dma.hbm_to_vmem [thread:$0]  %s647_s2, 2048, %s49_s13, [#allocation7], %s561_s1, %s561_s1, %s562_s9  }
  0x34   :  { %551 = dma.done.wait [#allocation4], 256  }
  0x35   :  { %552 = vsyncadd [#allocation4], 4294967040 }
  0x36   :  { %553 = dma.done.wait [#allocation7], 6144  }
  0x37   :  { %554 = vsyncadd [#allocation7], 4294961152  ;;  %v564_v0 = vmov 0.0   ;;  %v77_v1 = vld [vmem:[#allocation6 + $0x8] sm:$0xff]  ;;  %v79_v2 = vld [vmem:[#allocation6 + $0x18] sm:$0xff]  ;;  %s565_s2 = smov [#allocation9]  }
  0x38   :  { %172 = vmatprep.mubr.f32.mxu0 %v564_v0  ;;  %v76_v3 = vld [vmem:[#allocation6] sm:$0xff]  ;;  %v382_v4 = vpack.c.bf16 %v79_v2, %v77_v1  ;;  %v78_v5 = vld [vmem:[#allocation6 + $0x10] sm:$0xff]  ;;  %v81_v6 = vld [vmem:[#allocation6 + $0x28] sm:$0xff]  ;;  %s316_s23 = sshll.u32 %s565_s2, 4  ;;  %s317_s23 = int_to_ptr.vmem [resolvable:$true] %s316_s23 }
  0x39   :  { %v83_v7 = vld [vmem:[#allocation6 + $0x38] sm:$0xff]  ;;  %v384_v8 = vpack.c.bf16 %v78_v5, %v76_v3  ;;  %v80_v10 = vld [vmem:[#allocation6 + $0x20] sm:$0xff]  ;;  %v82_v11 = vld [vmem:[#allocation6 + $0x30] sm:$0xff]  ;;  %s529_s24 = scalar_lea.vmem %s317_s23, 256  ;;  %p534_p11 = scmp.lt.s32.totalorder %s317_s23, %s317_s23 }
  0x3a   :  { %v386_v9 = vpack.c.bf16 %v83_v7, %v81_v6  ;;  %v85_v12 = vld [vmem:[#allocation6 + $0x48] sm:$0xff]  ;;  %383 = vmatprep.subr.bf16.mxu0 %v382_v4  ;;  %v87_v13 = vld [vmem:[#allocation6 + $0x58] sm:$0xff]  ;;  %v388_v14 = vpack.c.bf16 %v82_v11, %v80_v10  ;;  %v84_v16 = vld [vmem:[#allocation6 + $0x40] sm:$0xff]  ;;  %p530_p10 = scmp.ne.s32.totalorder %s317_s23, %s529_s24  ;;  %p535_p12 = scmp.lt.s32.totalorder %s529_s24, %s529_s24 }
  0x3b   :  { %385 = vmatpush1.bf16.msra.mxu0 %v384_v8  ;;  %v390_v15 = vpack.c.bf16 %v87_v13, %v85_v12  ;;  %v86_v17 = vld [vmem:[#allocation6 + $0x50] sm:$0xff]  ;;  %v89_v18 = vld [vmem:[#allocation6 + $0x68] sm:$0xff]  ;;  %v91_v19 = vld [vmem:[#allocation6 + $0x78] sm:$0xff] }
  0x3c   :  { %387 = vmatprep.subr.bf16.mxu0 %v386_v9  ;;  %v392_v20 = vpack.c.bf16 %v86_v17, %v84_v16  ;;  %v394_v21 = vpack.c.bf16 %v91_v19, %v89_v18  ;;  %v88_v22 = vld [vmem:[#allocation6 + $0x60] sm:$0xff]  ;;  %v90_v23 = vld [vmem:[#allocation6 + $0x70] sm:$0xff]  ;;  %v93_v24 = vld [vmem:[#allocation6 + $0x88] sm:$0xff]  ;;  %p536_p13 = por %p535_p12, %p534_p11 }
  0x3d   :  { %v95_v25 = vld [vmem:[#allocation6 + $0x98] sm:$0xff]  ;;  %v396_v26 = vpack.c.bf16 %v90_v23, %v88_v22  ;;  %v92_v28 = vld [vmem:[#allocation6 + $0x80] sm:$0xff]  ;;  %v94_v29 = vld [vmem:[#allocation6 + $0x90] sm:$0xff] }
  0x3e   :  { %v398_v27 = vpack.c.bf16 %v95_v25, %v93_v24  ;;  %v97_v30 = vld [vmem:[#allocation6 + $0xa8] sm:$0xff]  ;;  %v99_v31 = vld [vmem:[#allocation6 + $0xb8] sm:$0xff]  ;;  %v400_v32 = vpack.c.bf16 %v94_v29, %v92_v28  ;;  %v96_v34 = vld [vmem:[#allocation6 + $0xa0] sm:$0xff]  ;;  %p537_p0 = pnand %p536_p13, %p530_p10 }
  0x3f   :  { %389 = vmatpush1.bf16.msra.mxu0 %v388_v14  ;;  %v402_v33 = vpack.c.bf16 %v99_v31, %v97_v30  ;;  %v98_v35 = vld [vmem:[#allocation6 + $0xb0] sm:$0xff]  ;;  %v101_v36 = vld [vmem:[#allocation6 + $0xc8] sm:$0xff]  ;;  %v103_v37 = vld [vmem:[#allocation6 + $0xd8] sm:$0xff] }
  0x40   :  { %391 = vmatprep.subr.bf16.mxu0 %v390_v15  ;;  %v404_v38 = vpack.c.bf16 %v98_v35, %v96_v34  ;;  %v406_v39 = vpack.c.bf16 %v103_v37, %v101_v36  ;;  %v100_v40 = vld [vmem:[#allocation6 + $0xc0] sm:$0xff]  ;;  %v102_v41 = vld [vmem:[#allocation6 + $0xd0] sm:$0xff]  ;;  %v105_v42 = vld [vmem:[#allocation6 + $0xe8] sm:$0xff] }
  0x41   :  { %v107_v43 = vld [vmem:[#allocation6 + $0xf8] sm:$0xff]  ;;  %v408_v44 = vpack.c.bf16 %v102_v41, %v100_v40  ;;  %v104_v46 = vld [vmem:[#allocation6 + $0xe0] sm:$0xff]  ;;  %v106_v47 = vld [vmem:[#allocation6 + $0xf0] sm:$0xff] }
  0x42   :  { %v410_v45 = vpack.c.bf16 %v107_v43, %v105_v42  ;;  %v412_v48 = vpack.c.bf16 %v106_v47, %v104_v46  ;;  %v74_v49 = vld [vmem:[#allocation3] sm:$0xff]  ;;  %v75_v50 = vld [vmem:[#allocation3 + $0x8] sm:$0xff]  ;;  %v209_v51 = vld [vmem:[#allocation8] sm:$0xff] }
  0x43   :  { %393 = vmatpush1.bf16.msra.mxu0 %v392_v20  ;;  %v210_v52 = vld [vmem:[#allocation8 + $0x8] sm:$0xff]  ;;  %v211_v54 = vld [vmem:[#allocation8 + $0x10] sm:$0xff]  ;;  %v212_v55 = vld [vmem:[#allocation8 + $0x18] sm:$0xff] }
  0x44   :  { %395 = vmatprep.subr.bf16.mxu0 %v394_v21  ;;  %v414_v53 = vpack.c.bf16 %v210_v52, %v209_v51  ;;  %v418_v56 = vpack.c.bf16 %v212_v55, %v211_v54  ;;  %v213_v57 = vld [vmem:[#allocation8 + $0x20] sm:$0xff]  ;;  %v214_v58 = vld [vmem:[#allocation8 + $0x28] sm:$0xff]  ;;  %v215_v60 = vld [vmem:[#allocation8 + $0x30] sm:$0xff] }
  0x45   :  { %v422_v59 = vpack.c.bf16 %v214_v58, %v213_v57  ;;  %v216_v61 = vld [vmem:[#allocation8 + $0x38] sm:$0xff]  ;;  %v217_v63 = vld [vmem:[#allocation8 + $0x40] sm:$0xff]  ;;  %v219_v2 = vld [vmem:[#allocation8 + $0x50] sm:$0xff] }
  0x46   :  { %415 = vmatprep.subr.bf16.mxu1 %v414_v53  ;;  %v426_v62 = vpack.c.bf16 %v216_v61, %v215_v60  ;;  %v220_v3 = vld [vmem:[#allocation8 + $0x58] sm:$0xff]  ;;  %v221_v5 = vld [vmem:[#allocation8 + $0x60] sm:$0xff]  ;;  %v222_v6 = vld [vmem:[#allocation8 + $0x68] sm:$0xff] }
  0x47   :  { %397 = vmatpush1.bf16.msra.mxu0 %v396_v26  ;;  %417 = vmatpush3.bf16.msra.mxu1 %v414_v53  ;;  %v434_v4 = vpack.c.bf16 %v220_v3, %v219_v2  ;;  %v438_v7 = vpack.c.bf16 %v222_v6, %v221_v5  ;;  %v223_v8 = vld [vmem:[#allocation8 + $0x70] sm:$0xff]  ;;  %v224_v9 = vld [vmem:[#allocation8 + $0x78] sm:$0xff] }
  0x48   :  { %399 = vmatprep.subr.bf16.mxu0 %v398_v27  ;;  %419 = vmatprep.subr.bf16.mxu1 %v418_v56  ;;  %v442_v10 = vpack.c.bf16 %v224_v9, %v223_v8 }
  0x4b   :  { %401 = vmatpush1.bf16.msra.mxu0 %v400_v32  ;;  %421 = vmatpush3.bf16.msra.mxu1 %v418_v56 }
  0x4c   :  { %403 = vmatprep.subr.bf16.mxu0 %v402_v33  ;;  %423 = vmatprep.subr.bf16.mxu1 %v422_v59 }
  0x4f   :  { %405 = vmatpush1.bf16.msra.mxu0 %v404_v38  ;;  %425 = vmatpush3.bf16.msra.mxu1 %v422_v59 }
  0x50   :  { %407 = vmatprep.subr.bf16.mxu0 %v406_v39  ;;  %427 = vmatprep.subr.bf16.mxu1 %v426_v62 }
  0x53   :  { %409 = vmatpush1.bf16.msra.mxu0 %v408_v44  ;;  %429 = vmatpush3.bf16.msra.mxu1 %v426_v62 }
  0x54   :  { %411 = vmatprep.subr.bf16.mxu0 %v410_v45 }
  0x57   :  { %413 = vmatpush1.bf16.msra.mxu0 %v412_v48 }
  0x5a   :  { %173 = vmatmul.mubr.f32.vlgmr.msra.gmra.mrb[0].mxu0 %v74_v49 }
  0x5b   :  { %178 = vmatprep.mubr.f32.mxu0 %v564_v0  ;;  %v218_v0 = vld [vmem:[#allocation8 + $0x48] sm:$0xff] }
  0x5c   :  { %v430_v1 = vpack.c.bf16 %v218_v0, %v217_v63 }
  0x5e   :  { %179 = vmatmul.mubr.f32.gmra.mrb[2].mxu0 %v75_v50  ;;  %431 = vmatprep.subr.bf16.mxu1 %v430_v1 }
  0x5f   :  { %433 = vmatpush3.bf16.msra.mxu1 %v430_v1 }
  0x60   :  { %435 = vmatprep.subr.bf16.mxu1 %v434_v4 }
  0x63   :  { %437 = vmatpush3.bf16.msra.mxu1 %v434_v4 }
  0x64   :  { %439 = vmatprep.subr.bf16.mxu1 %v438_v7 }
  0x67   :  { %441 = vmatpush3.bf16.msra.mxu1 %v438_v7 }
  0x68   :  { %443 = vmatprep.subr.bf16.mxu1 %v442_v10 }
  0x6b   :  { %445 = vmatpush3.bf16.msra.mxu1 %v442_v10 }
 0x12d   :  { %v174_v11 = vpop.f32.mrb[0].mxu0 }
 0x12e   :  { %v185_v12 = vand.u32 2147483647, %v174_v11  ;;  %v176_v13 = vpop.f32.mrb[1].mxu0  ;;  %vm197_vm0 = vcmp.ge.f32.partialorder %v174_v11, 0.0 }
 0x130   :  { %v187_v14 = vsub.f32 0.0, %v185_v12 }
 0x131   :  { %v180_v15 = vpop.f32.mrb[2].mxu0 }
 0x132   :  { %v189_v16 = vmul.f32 1.442695, %v187_v14  ;;  %v186_v17 = vand.u32 2147483647, %v180_v15  ;;  %v182_v18 = vpop.f32.mrb[3].mxu0  ;;  %vm198_vm1 = vcmp.ge.f32.partialorder %v180_v15, 0.0 }
 0x134   :  { %455 = vpow2.f32 %v189_v16  ;;  %v188_v19 = vsub.f32 0.0, %v186_v17 }
 0x136   :  { %v191_v20 = vmul.f32 1.442695, %v188_v19 }
 0x138   :  { %457 = vpow2.f32 %v191_v20 }
 0x13e   :  { %v456_v21 = vpop.eup %455 }
 0x13f   :  { %v193_v22 = vadd.f32 1.0, %v456_v21 }
 0x141   :  { %459 = vrcp.f32 %v193_v22 }
 0x142   :  { %v458_v23 = vpop.eup %457 }
 0x143   :  { %v194_v24 = vadd.f32 1.0, %v458_v23 }
 0x145   :  { %461 = vrcp.f32 %v194_v24 }
 0x14b   :  { %v460_v25 = vpop.eup %459 }
 0x14c   :  { %v199_v26 = vmul.f32 %v460_v25, %v456_v21 }
 0x14e   :  { %v201_v27 = vsel %vm197_vm0, %v460_v25, %v199_v26 }
 0x14f   :  { %v462_v28 = vpop.eup %461  ;;  %v203_v29 = vmul.f32 %v201_v27, %v174_v11 }
 0x150   :  { %v200_v30 = vmul.f32 %v462_v28, %v458_v23 }
 0x151   :  { %v205_v31 = vmul.f32 %v203_v29, %v176_v13 }
 0x152   :  { %v202_v32 = vsel %vm198_vm1, %v462_v28, %v200_v30 }
 0x153   :  { %v204_v33 = vmul.f32 %v202_v32, %v180_v15  ;;  %379 = vmatprep.mubr.f32.mxu1 %v205_v31 }
 0x155   :  { %v206_v34 = vmul.f32 %v204_v33, %v182_v18 }
 0x157   :  { %380 = vmatmul.mubr.f32.vlgmr.msra.gmra.mrb[0].mxu1 %v206_v34 }
 0x22a   :  { %v381_v35 = vpop.f32.mrb[0].mxu1 }
 0x22b   :  { %310 = vst [vmem:[#allocation9 + $0x8] sm:$0xff] %v381_v35  ;;  %v291_v36 = vpop.f32.mrb[1].mxu1 }
 0x22c   :  { %309 = vst [vmem:[#allocation9] sm:$0xff] %v291_v36 }
 0x22d   :  { %540 = shalt.err (!%p537_p0)
}
 0x22e   :  { %s541_s27 = scalar_lea.hbm %s648_s3, 256 }
 0x22f   :  { %p542_p1 = scmp.ne.s32.totalorder %s648_s3, %s541_s27  ;;  %p545_p2 = scmp.lt.u32.totalorder %s541_s27, %s648_s3 }
 0x231   :  { %p547_p3 = pnand %p545_p2, %p542_p1 }
 0x233   :  { %550 = shalt.err (!%p547_p3)
}
 0x234   :  { %322 = dma.vmem_to_hbm [thread:$0]  %s317_s23, 256, %s648_s3, [#allocation5], %s561_s1, %s561_s1, %s562_s9  }
 0x235   :  { %555 = dma.done.wait [#allocation5], 256  }
 0x236   :  { %556 = vsyncadd [#allocation5], 4294967040 }
 0x237   :  { %326 = vsyncpa [#allocation4], 1 }
 0x238   :  { %327 = vsyncpa [#allocation7], 1 }
 0x239   :  { %328 = vsyncpa [#allocation5], 1 }

</bundles_post_ra>
